<compile_context>
chip_gen: v7x
topology: tpu7x:2x2x1
jax: 0.10.0
libtpu: 0.0.40
codegen_flags: <defaults>
</compile_context>

<pallas_src>
import jax
import jax.numpy as jnp
from jax import lax
from jax.experimental import pallas as pl
from jax.experimental.pallas import tpu as pltpu


def _round_up(x, m):
    return ((x + m - 1) // m) * m


def _pick_chunk(tm, target=1024):
    """Largest lane-chunk <= target that divides tm (tm is a multiple of 128)."""
    if tm <= target:
        return tm
    for ch in range(target, 0, -128):
        if tm % ch == 0:
            return ch
    return 128


def _make_value_net_kernel(chunk, n_chunks):
    def kernel(x_ref, w1_ref, b1_ref, w2_ref, b2_ref, w3c_ref, b3_ref, o_ref):
        # x_ref: (TM, S) batch tile of the state (batch-major, exactly as in HBM).
        # Weights are PyTorch layout (out_features, in_features); biases are columns
        # so they broadcast over the lane (batch) axis.
        w1 = w1_ref[...]      # (L, S)
        b1 = b1_ref[...]      # (L, 1)
        w2 = w2_ref[...]      # (L, L)
        b2 = b2_ref[...]      # (L, 1)
        w3c = w3c_ref[...]    # (L, 1)
        b3 = b3_ref[...]      # (1, 1)

        # Static lane-chunk loop: offsets are Python ints -> zero-cost ref views.
        # Chunking keeps the (L, chunk) activation slabs small at large TM; any
        # scheduler-induced spills are cheap VMEM traffic.
        for c in range(n_chunks):
            off = c * chunk
            x = x_ref[pl.ds(off, chunk), :]                       # (chunk, S)

            # Contract both operands on S: (L, S) x (chunk, S) -> (L, chunk).
            # Keeps batch on lanes without any host-side transpose of the state.
            h1 = lax.dot_general(
                w1, x, (((1,), (1,)), ((), ())),
                preferred_element_type=jnp.float32) + b1
            h1 = jnp.maximum(h1, 0.0)                             # (L, chunk)

            h2 = jnp.dot(w2, h1, preferred_element_type=jnp.float32) + b2
            h2 = jnp.maximum(h2, 0.0)                             # (L, chunk)

            # fc3 single output unit: VPU multiply + sublane reduce (off the MXU).
            out = jnp.sum(h2 * w3c, axis=0, keepdims=True) + b3   # (1, chunk)
            o_ref[:, pl.ds(off, chunk)] = out.astype(o_ref.dtype)

    return kernel


def value_network_forward(state, params, *, max_tile=4096):
    """state: (B, state_size) float32. Returns (B, 1) float32."""
    w1, b1, w2, b2, w3, b3 = (
        params["w1"], params["b1"], params["w2"],
        params["b2"], params["w3"], params["b3"],
    )
    B, S = state.shape
    L = w1.shape[0]

    # Batch tile (lane axis): a single grid step when the whole padded batch fits
    # one tile (removes all pipeline prologue/epilogue); otherwise max_tile-wide
    # tiles.  max_tile=4096 keeps the double-buffered footprint comfortably under
    # the scoped-VMEM defaults on v5e/v6e/v7x.
    assert max_tile % 128 == 0
    tm_full = _round_up(B, 128)
    TM = tm_full if tm_full <= max_tile else max_tile
    Bp = _round_up(B, TM)
    grid = (Bp // TM,)

    # Per-tile lane chunking keeps vreg pressure flat when TM > ~1024.
    chunk = _pick_chunk(TM)
    n_chunks = TM // chunk

    # Pad the batch axis only when needed (fast path skips jnp.pad entirely).
    # Padded rows stay finite through ReLU/fc3 and are sliced away below.
    x = state if Bp == B else jnp.pad(state, ((0, Bp - B), (0, 0)))

    # Biases / fc3 weight as columns (broadcast over the lane/batch axis).
    b1c = b1.reshape(L, 1)
    b2c = b2.reshape(L, 1)
    w3c = w3.reshape(1, L).T          # (L, 1)
    b3c = b3.reshape(1, 1)

    resident = lambda a: pl.BlockSpec(a.shape, lambda i: (0, 0))  # stays in VMEM

    itemsize = jnp.dtype(jnp.float32).itemsize
    cost = pl.CostEstimate(
        flops=2 * B * (S * L + L * L + L),
        transcendentals=0,
        bytes_accessed=(B * S + B + w1.size + b1.size + w2.size + b2.size
                        + w3.size + b3.size) * itemsize,
    )

    kernel = _make_value_net_kernel(chunk, n_chunks)

    out_t = pl.pallas_call(
        kernel,
        out_shape=jax.ShapeDtypeStruct((1, Bp), jnp.float32),
        grid=grid,
        in_specs=[
            pl.BlockSpec((TM, S), lambda i: (i, 0)),   # state: streamed per batch tile
            resident(w1), resident(b1c),
            resident(w2), resident(b2c),
            resident(w3c), resident(b3c),
        ],
        out_specs=pl.BlockSpec((1, TM), lambda i: (0, i)),  # lane-dense output block
        compiler_params=pltpu.CompilerParams(
            # Independent batch tiles -> shard multi-step grids across v7x's 2 TCs.
            dimension_semantics=("parallel",),
        ),
        cost_estimate=cost,
    )(x, w1, b1c, w2, b2c, w3c, b3c)

    return out_t[:, :B].T                                   # (B, 1)


def init_params(key, state_size, layer_size=24):
    """nn.Linear-style init (U[-1/sqrt(fan_in), 1/sqrt(fan_in)]).

    Weights are stored in PyTorch layout: (out_features, in_features).
    """
    ks = jax.random.split(key, 6)

    def linear(kw, kb, fan_in, fan_out):
        bound = 1.0 / jnp.sqrt(fan_in)
        w = jax.random.uniform(kw, (fan_out, fan_in), jnp.float32, -bound, bound)
        b = jax.random.uniform(kb, (fan_out,), jnp.float32, -bound, bound)
        return w, b

    w1, b1 = linear(ks[0], ks[1], state_size, layer_size)
    w2, b2 = linear(ks[2], ks[3], layer_size, layer_size)
    w3, b3 = linear(ks[4], ks[5], layer_size, 1)
    return {"w1": w1, "b1": b1, "w2": w2, "b2": b2, "w3": w3, "b3": b3}


def value_network_ref(state, params):
    """Pure-JAX reference (PyTorch-layout weights: y = x @ W.T + b)."""
    x = jnp.maximum(state @ params["w1"].T + params["b1"], 0.0)
    x = jnp.maximum(x @ params["w2"].T + params["b2"], 0.0)
    return x @ params["w3"].T + params["b3"]


if __name__ == "__main__":
    key = jax.random.PRNGKey(0)
    k_param, k_state = jax.random.split(key)

    batch = 2
    state_size = 8
    layer_size = 24

    params = init_params(k_param, state_size, layer_size)
    state = jax.random.normal(k_state, (batch, state_size), dtype=jnp.float32)

    out = jax.block_until_ready(value_network_forward(state, params))
    ref = value_network_ref(state, params)
    assert out.shape == (batch, 1), out.shape
    assert jnp.allclose(out, ref, atol=1e-5, rtol=1e-5), (out, ref)

    # Ragged batch that still fits a single tile (grid=(1,), padded lane columns).
    mid_state = jax.random.normal(jax.random.PRNGKey(1), (1000, state_size), jnp.float32)
    mid_out = jax.block_until_ready(value_network_forward(mid_state, params))
    mid_ref = value_network_ref(mid_state, params)
    assert mid_out.shape == (1000, 1), mid_out.shape
    assert jnp.allclose(mid_out, mid_ref, atol=1e-4, rtol=1e-4)

    # Large ragged batch: multiple grid steps, multi-chunk tiles, padded last tile.
    big_state = jax.random.normal(jax.random.PRNGKey(2), (5000, state_size), jnp.float32)
    big_out = jax.block_until_ready(value_network_forward(big_state, params))
    big_ref = value_network_ref(big_state, params)
    assert big_out.shape == (5000, 1), big_out.shape
    assert jnp.allclose(big_out, big_ref, atol=1e-4, rtol=1e-4)

    print("KERNEL_OK")
</pallas_src>

<mosaic_0001>
module attributes {stable_mosaic.version = 11 : i64} {
  func.func @kernel(%arg0: i32, %arg1: memref<128x8xf32, #tpu.memory_space<vmem>>, %arg2: memref<24x8xf32, #tpu.memory_space<vmem>>, %arg3: memref<24x1xf32, #tpu.memory_space<vmem>>, %arg4: memref<24x24xf32, #tpu.memory_space<vmem>>, %arg5: memref<24x1xf32, #tpu.memory_space<vmem>>, %arg6: memref<24x1xf32, #tpu.memory_space<vmem>>, %arg7: memref<1x1xf32, #tpu.memory_space<vmem>>, %arg8: memref<1x128xf32, #tpu.memory_space<vmem>>) attributes {dimension_semantics = [#tpu.dimension_semantics<parallel>], iteration_bounds = array<i64: 1>, scalar_prefetch = 0 : i64, scratch_operands = 0 : i64, tpu.core_type = #tpu.core_type<tc>, window_params = [{transform_indices = @transform_0, window_bounds = array<i64: 128, 8>}, {pipeline_mode = #tpu.pipeline_mode<synchronous>, transform_indices = @transform_1, window_bounds = array<i64: 24, 8>}, {pipeline_mode = #tpu.pipeline_mode<synchronous>, transform_indices = @transform_2, window_bounds = array<i64: 24, 1>}, {pipeline_mode = #tpu.pipeline_mode<synchronous>, transform_indices = @transform_3, window_bounds = array<i64: 24, 24>}, {pipeline_mode = #tpu.pipeline_mode<synchronous>, transform_indices = @transform_4, window_bounds = array<i64: 24, 1>}, {pipeline_mode = #tpu.pipeline_mode<synchronous>, transform_indices = @transform_5, window_bounds = array<i64: 24, 1>}, {pipeline_mode = #tpu.pipeline_mode<synchronous>, transform_indices = @transform_6, window_bounds = array<i64: 1, 1>}, {transform_indices = @transform_7, window_bounds = array<i64: 1, 128>}]} {
    %c0 = arith.constant 0 : index
    %c0_0 = arith.constant 0 : index
    %0 = vector.load %arg2[%c0, %c0_0] : memref<24x8xf32, #tpu.memory_space<vmem>>, vector<24x8xf32>
    %c0_1 = arith.constant 0 : index
    %c0_2 = arith.constant 0 : index
    %1 = vector.load %arg3[%c0_1, %c0_2] : memref<24x1xf32, #tpu.memory_space<vmem>>, vector<24x1xf32>
    %c0_3 = arith.constant 0 : index
    %c0_4 = arith.constant 0 : index
    %2 = vector.load %arg4[%c0_3, %c0_4] : memref<24x24xf32, #tpu.memory_space<vmem>>, vector<24x24xf32>
    %c0_5 = arith.constant 0 : index
    %c0_6 = arith.constant 0 : index
    %3 = vector.load %arg5[%c0_5, %c0_6] : memref<24x1xf32, #tpu.memory_space<vmem>>, vector<24x1xf32>
    %c0_7 = arith.constant 0 : index
    %c0_8 = arith.constant 0 : index
    %4 = vector.load %arg6[%c0_7, %c0_8] : memref<24x1xf32, #tpu.memory_space<vmem>>, vector<24x1xf32>
    %c0_9 = arith.constant 0 : index
    %c0_10 = arith.constant 0 : index
    %5 = vector.load %arg7[%c0_9, %c0_10] : memref<1x1xf32, #tpu.memory_space<vmem>>, vector<1x1xf32>
    %c0_11 = arith.constant 0 : index
    %c0_12 = arith.constant 0 : index
    %6 = vector.load %arg1[%c0_11, %c0_12] : memref<128x8xf32, #tpu.memory_space<vmem>>, vector<128x8xf32>
    %cst = arith.constant dense<0.000000e+00> : vector<24x128xf32>
    %7 = tpu.matmul %0, %6, %cst {dimension_numbers = #tpu.dot_dimension_numbers<[1], [1], [0], [0], [0, 0, 1, 0], [], []>} : vector<24x8xf32>, vector<128x8xf32>, vector<24x128xf32> -> vector<24x128xf32>
    %8 = vector.broadcast %1 : vector<24x1xf32> to vector<24x128xf32>
    %9 = arith.addf %7, %8 : vector<24x128xf32>
    %cst_13 = arith.constant 0.000000e+00 : f32
    %10 = vector.broadcast %cst_13 : f32 to vector<24x128xf32>
    %11 = arith.maximumf %9, %10 : vector<24x128xf32>
    %cst_14 = arith.constant dense<0.000000e+00> : vector<24x128xf32>
    %12 = tpu.matmul %2, %11, %cst_14 {dimension_numbers = #tpu.dot_dimension_numbers<[1], [0], [0], [1], [0, 0, 1, 1], [], []>} : vector<24x24xf32>, vector<24x128xf32>, vector<24x128xf32> -> vector<24x128xf32>
    %13 = vector.broadcast %3 : vector<24x1xf32> to vector<24x128xf32>
    %14 = arith.addf %12, %13 : vector<24x128xf32>
    %cst_15 = arith.constant 0.000000e+00 : f32
    %15 = vector.broadcast %cst_15 : f32 to vector<24x128xf32>
    %16 = arith.maximumf %14, %15 : vector<24x128xf32>
    %17 = vector.broadcast %4 : vector<24x1xf32> to vector<24x128xf32>
    %18 = arith.mulf %16, %17 : vector<24x128xf32>
    %cst_16 = arith.constant dense<0.000000e+00> : vector<128xf32>
    %19 = vector.multi_reduction <add>, %18, %cst_16 [0] : vector<24x128xf32> to vector<128xf32>
    %20 = vector.shape_cast %19 : vector<128xf32> to vector<1x128xf32>
    %21 = vector.broadcast %5 : vector<1x1xf32> to vector<1x128xf32>
    %22 = arith.addf %20, %21 : vector<1x128xf32>
    %c0_17 = arith.constant 0 : index
    %c0_18 = arith.constant 0 : index
    %23 = vector.load %arg8[%c0_17, %c0_18] : memref<1x128xf32, #tpu.memory_space<vmem>>, vector<1x128xf32>
    tpu.vector_store %arg8[%c0_17, %c0_18], %22 {strides = array<i32>} : memref<1x128xf32, #tpu.memory_space<vmem>>, vector<1x128xf32>,
    return
  }
  func.func @transform_0(%arg0: i32) -> (i32, i32) {
    %c0_i32 = arith.constant 0 : i32
    %c0_i32_0 = arith.constant 0 : i32
    return %arg0, %c0_i32 : i32, i32
  }
  func.func @transform_1(%arg0: i32) -> (i32, i32) {
    %c0_i32 = arith.constant 0 : i32
    %c0_i32_0 = arith.constant 0 : i32
    %c0_i32_1 = arith.constant 0 : i32
    return %c0_i32, %c0_i32_0 : i32, i32
  }
  func.func @transform_2(%arg0: i32) -> (i32, i32) {
    %c0_i32 = arith.constant 0 : i32
    %c0_i32_0 = arith.constant 0 : i32
    %c0_i32_1 = arith.constant 0 : i32
    return %c0_i32, %c0_i32_0 : i32, i32
  }
  func.func @transform_3(%arg0: i32) -> (i32, i32) {
    %c0_i32 = arith.constant 0 : i32
    %c0_i32_0 = arith.constant 0 : i32
    %c0_i32_1 = arith.constant 0 : i32
    return %c0_i32, %c0_i32_0 : i32, i32
  }
  func.func @transform_4(%arg0: i32) -> (i32, i32) {
    %c0_i32 = arith.constant 0 : i32
    %c0_i32_0 = arith.constant 0 : i32
    %c0_i32_1 = arith.constant 0 : i32
    return %c0_i32, %c0_i32_0 : i32, i32
  }
  func.func @transform_5(%arg0: i32) -> (i32, i32) {
    %c0_i32 = arith.constant 0 : i32
    %c0_i32_0 = arith.constant 0 : i32
    %c0_i32_1 = arith.constant 0 : i32
    return %c0_i32, %c0_i32_0 : i32, i32
  }
  func.func @transform_6(%arg0: i32) -> (i32, i32) {
    %c0_i32 = arith.constant 0 : i32
    %c0_i32_0 = arith.constant 0 : i32
    %c0_i32_1 = arith.constant 0 : i32
    return %c0_i32, %c0_i32_0 : i32, i32
  }
  func.func @transform_7(%arg0: i32) -> (i32, i32) {
    %c0_i32 = arith.constant 0 : i32
    %c0_i32_0 = arith.constant 0 : i32
    return %c0_i32, %arg0 : i32, i32
  }
}

</mosaic_0001>

<bundles_post_ra>
// kernel: tpu_custom_call.1
= control target key start
LH: loop header
LB: loop body
LE: loop exit
PB: predicated region body
PF: predicated region fallthrough
CT: control target
= control target key end

     0   :  { %s745_s0 = inlined_call_operand.vmem [shape: f32[128,8], index: 0, kind: input, shape index: {}]   ;;  %s746_s1 = inlined_call_operand.vmem [shape: f32[24,8], index: 1, kind: input, shape index: {}]   ;;  %s747_s2 = inlined_call_operand.vmem [shape: f32[24,1], index: 2, kind: input, shape index: {}]   ;;  %s748_s3 = inlined_call_operand.vmem [shape: f32[24,24], index: 3, kind: input, shape index: {}]   ;;  %s749_s4 = inlined_call_operand.vmem [shape: f32[24,1], index: 4, kind: input, shape index: {}]   ;;  %s750_s5 = inlined_call_operand.vmem [shape: f32[24,1], index: 5, kind: input, shape index: {}]   ;;  %s751_s6 = inlined_call_operand.<no memory space> [shape: f32[1,1], index: 6, kind: input, shape index: {}]   ;;  %s752_s7 = inlined_call_operand.hbm [shape: f32[1,128], index: 7, kind: output, shape index: {}]  }
   0x1   :  { %v12_v0 = vstv %s751_s6 }
   0x2   :  { %13 = vst [vmem:[#allocation2] sm:$0x1] %v12_v0 }
   0x3   :  { %v45_v1 = vld [vmem:[%s745_s0] sm:$0xff]  ;;  %v46_v2 = vld [vmem:[%s745_s0 + $0x8] sm:$0xff]  ;;  %vm76_vm0 = vcmask 64512   ;;  %v545_v3 = vmov 0.0|0.0   ;;  %vm546_vm2 = vmmov 0   ;;  %v547_v6 = vmov 0.0  }
   0x4   :  { %479 = vmatprep.subr.bf16.mxu0 %v545_v3  ;;  %v480_v4 = vpack.c.bf16 %v46_v2, %v45_v1  ;;  %vm602_vm1 = vmpackc.low %vm76_vm0, %vm76_vm0  ;;  %511 = vmatprep.subr.bf16.mxu1 %v545_v3  ;;  %v548_v7 = vmov 0   ;;  %v47_v8 = vld [vmem:[%s745_s0 + $0x10] sm:$0xff]  ;;  %v48_v9 = vld [vmem:[%s745_s0 + $0x18] sm:$0xff] }
   0x5   :  { %455 = vmatprep.mubr.msk.f32.mxu0 %vm546_vm2, %v547_v6  ;;  %519 = vset.pattern.permute.xlu0 %v548_v7  ;;  %v32_v10 = vld [vmem:[%s747_s2] sm:$0xff]  ;;  %v484_v11 = vpack.c.bf16 %v48_v9, %v47_v8  ;;  %v34_v12 = vld [vmem:[%s747_s2 + $0x10] sm:$0xff]  ;;  %v33_v13 = vld [vmem:[%s747_s2 + $0x8] sm:$0xff] }
   0x6   :  { %482 = vmatpush3.bf16.xpose.msk.msra.mxu0 %vm602_vm1, %v480_v4  ;;  %520 = vset.pattern.permute.xlu1 %v548_v7  ;;  %v38_v14 = vld [vmem:[%s749_s4] sm:$0xff] }
   0x7   :  { %483 = vmatprep.subr.bf16.mxu0 %v545_v3  ;;  %470 = vmatprep.mubr.msk.f32.mxu1 %vm546_vm2, %v547_v6 }
   0x8   :  { %63 = vperm.xlu0 %519, %v32_v10   ;;  %73 = vperm.xlu1 %520, %v34_v12  }
   0x9   :  { %14 = vsyncpa [#allocation4], 0  ;;  %v49_v15 = vld [vmem:[%s745_s0 + $0x20] sm:$0xff]  ;;  %v50_v16 = vld [vmem:[%s745_s0 + $0x28] sm:$0xff]  ;;  %vm232_vm3 = vcmask 195584  }
   0xa   :  { %v39_v17 = vld [vmem:[%s749_s4 + $0x8] sm:$0xff]  ;;  %v40_v18 = vld [vmem:[%s749_s4 + $0x10] sm:$0xff]  ;;  %v488_v19 = vpack.c.bf16 %v50_v16, %v49_v15  ;;  %v41_v20 = vld [vmem:[%s750_s5] sm:$0xff] }
   0xb   :  { %v42_v21 = vld [vmem:[%s750_s5 + $0x8] sm:$0xff]  ;;  %v51_v22 = vld [vmem:[%s745_s0 + $0x30] sm:$0xff]  ;;  %v52_v23 = vld [vmem:[%s745_s0 + $0x38] sm:$0xff] }
   0xc   :  { %68 = vperm.xlu0 %519, %v33_v13   ;;  %219 = vperm.xlu1 %520, %v38_v14   ;;  %v43_v24 = vld [vmem:[%s750_s5 + $0x10] sm:$0xff]  ;;  %v44_v25 = vld [vmem:[#allocation2] sm:$0x1]  ;;  %v492_v26 = vpack.c.bf16 %v52_v23, %v51_v22  ;;  %v54_v28 = vld [vmem:[%s745_s0 + $0x48] sm:$0xff] }
   0xd   :  { %v53_v27 = vld [vmem:[%s745_s0 + $0x40] sm:$0xff]  ;;  %v55_v30 = vld [vmem:[%s745_s0 + $0x50] sm:$0xff]  ;;  %v56_v31 = vld [vmem:[%s745_s0 + $0x58] sm:$0xff] }
   0xe   :  { %486 = vmatpush3.bf16.xpose.msk.msra.mxu0 %vm602_vm1, %v484_v11  ;;  %v496_v29 = vpack.c.bf16 %v54_v28, %v53_v27  ;;  %v500_v32 = vpack.c.bf16 %v56_v31, %v55_v30  ;;  %v57_v33 = vld [vmem:[%s745_s0 + $0x60] sm:$0xff]  ;;  %v58_v34 = vld [vmem:[%s745_s0 + $0x68] sm:$0xff]  ;;  %v59_v36 = vld [vmem:[%s745_s0 + $0x70] sm:$0xff] }
   0xf   :  { %487 = vmatprep.subr.bf16.mxu0 %v545_v3  ;;  %v504_v35 = vpack.c.bf16 %v58_v34, %v57_v33  ;;  %v60_v37 = vld [vmem:[%s745_s0 + $0x78] sm:$0xff]  ;;  %v29_v39 = vld [vmem:[%s746_s1] sm:$0xff]  ;;  %v30_v40 = vld [vmem:[%s746_s1 + $0x8] sm:$0xff] }
  0x10   :  { %224 = vperm.xlu0 %519, %v39_v17   ;;  %229 = vperm.xlu1 %520, %v40_v18   ;;  %v508_v38 = vpack.c.bf16 %v60_v37, %v59_v36  ;;  %v31_v41 = vld [vmem:[%s746_s1 + $0x10] sm:$0xff]  ;;  %v35_v58 = vld [vmem:[%s748_s3] sm:$0xff]  ;;  %v36_v59 = vld [vmem:[%s748_s3 + $0x8] sm:$0xff] }
  0x11   :  { %v37_v60 = vld [vmem:[%s748_s3 + $0x10] sm:$0xff]  ;;  %s549_s3 = smov [#allocation3]  }
  0x12   :  { %s368_s9 = sshll.u32 %s549_s3, 4  ;;  %s369_s9 = int_to_ptr.vmem [resolvable:$true] %s368_s9 }
  0x13   :  { %s521_s10 = scalar_lea.vmem %s369_s9, 16  ;;  %s525_s11 = scalar_lea.vmem %s369_s9, 32 }
  0x14   :  { %327 = vperm.xlu0 %519, %v41_v20   ;;  %332 = vperm.xlu1 %520, %v42_v21   ;;  %p522_p0 = scmp.ne.s32.totalorder %s369_s9, %s521_s10  ;;  %p526_p1 = scmp.lt.s32.totalorder %s369_s9, %s369_s9 }
  0x15   :  { %p527_p2 = scmp.lt.s32.totalorder %s525_s11, %s521_s10 }
  0x16   :  { %490 = vmatpush3.bf16.xpose.msk.msra.mxu0 %vm602_vm1, %v488_v19  ;;  %v356_v19 = vlaneseq }
  0x17   :  { %491 = vmatprep.subr.bf16.mxu0 %v545_v3  ;;  %p528_p3 = por %p527_p2, %p526_p1 }
  0x18   :  { %337 = vperm.xlu0 %519, %v43_v24   ;;  %353 = vperm.xlu1 %520, %v44_v25   ;;  %v357_v22 = vshrl.u32 %v356_v19, 7 }
  0x19   :  { %p529_p4 = pnand %p528_p3, %p522_p0 }
  0x1a   :  { %v358_v25 = vsub.s32 0, %v357_v22 }
  0x1e   :  { %494 = vmatpush3.bf16.xpose.msk.msra.mxu0 %vm602_vm1, %v492_v26 }
  0x1f   :  { %495 = vmatprep.subr.bf16.mxu0 %v545_v3 }
  0x26   :  { %498 = vmatpush3.bf16.xpose.msk.msra.mxu0 %vm602_vm1, %v496_v29 }
  0x27   :  { %499 = vmatprep.subr.bf16.mxu0 %v545_v3 }
  0x2e   :  { %502 = vmatpush3.bf16.xpose.msk.msra.mxu0 %vm602_vm1, %v500_v32 }
  0x2f   :  { %503 = vmatprep.subr.bf16.mxu0 %v545_v3 }
  0x36   :  { %506 = vmatpush3.bf16.xpose.msk.msra.mxu0 %vm602_vm1, %v504_v35 }
  0x37   :  { %507 = vmatprep.subr.bf16.mxu0 %v545_v3 }
  0x3e   :  { %510 = vmatpush3.bf16.xpose.msk.msra.mxu0 %vm602_vm1, %v508_v38 }
  0x45   :  { %456 = vmatmul.mubr.msk.f32.vlgmr.msra.gmra.mrb[0].mxu0 %vm76_vm0, %v29_v39 }
  0x46   :  { %458 = vmatprep.mubr.msk.f32.mxu0 %vm546_vm2, %v547_v6 }
  0x49   :  { %459 = vmatmul.mubr.msk.f32.gmra.mrb[2].mxu0 %vm76_vm0, %v30_v40 }
  0x4a   :  { %461 = vmatprep.mubr.msk.f32.mxu0 %vm546_vm2, %v547_v6 }
  0x4d   :  { %462 = vmatmul.mubr.msk.f32.gmra.mrb[4].mxu0 %vm76_vm0, %v31_v41 }
  0x87   :  { %v64_v42 = vpop.permute.xlu0 %63  ;;  %v74_v52 = vpop.permute.xlu1 %73 }
  0x8b   :  { %v69_v46 = vpop.permute.xlu0 %68  ;;  %v220_v61 = vpop.permute.xlu1 %219 }
  0x8f   :  { %v225_v62 = vpop.permute.xlu0 %224  ;;  %v230_v2 = vpop.permute.xlu1 %229 }
  0x93   :  { %v328_v8 = vpop.permute.xlu0 %327  ;;  %v333_v10 = vpop.permute.xlu1 %332 }
  0x97   :  { %v338_v17 = vpop.permute.xlu0 %337  ;;  %v354_v27 = vpop.permute.xlu1 %353 }
  0x98   :  { %v359_v29 = vrot.slane %v354_v27, %v358_v25 }
 0x118   :  { %v200_v43 = vpop.f32.mrb[0].mxu0 }
 0x119   :  { %v457_v44 = vpop.f32.mrb[1].mxu0  ;;  %v201_v45 = vadd.f32 %v200_v43, %v64_v42 }
 0x11b   :  { %v214_v50 = vmax.f32 %v201_v45, 0.0 }
 0x11c   :  { %v205_v47 = vpop.f32.mrb[2].mxu0 }
 0x11d   :  { %v206_v48 = vadd.f32 %v205_v47, %v69_v46  ;;  %v460_v49 = vpop.f32.mrb[3].mxu0 }
 0x11f   :  { %v215_v51 = vmax.f32 %v206_v48, 0.0 }
 0x120   :  { %v210_v53 = vpop.f32.mrb[4].mxu0 }
 0x121   :  { %v211_v54 = vadd.f32 %v210_v53, %v74_v52  ;;  %v463_v55 = vpop.f32.mrb[5].mxu0  ;;  %v512_v56 = vpack.c.bf16 %v215_v51, %v214_v50 }
 0x123   :  { %v216_v57 = vmax.f32 %v211_v54, 0.0  ;;  %513 = vmatpush3.bf16.msra.mxu1 %v512_v56 }
 0x124   :  { %468 = vmatprep.subr.mxu1 %v547_v6 }
 0x127   :  { %469 = vmatpush3.msra.mxu1 %v216_v57 }
 0x128   :  { %471 = vmatmul.mubr.msk.f32.vlgmr.msra.gmra.mrb[0].mxu1 %vm232_vm3, %v35_v58 }
 0x129   :  { %473 = vmatprep.mubr.msk.f32.mxu1 %vm546_vm2, %v547_v6 }
 0x12c   :  { %474 = vmatmul.mubr.msk.f32.gmra.mrb[2].mxu1 %vm232_vm3, %v36_v59 }
 0x12d   :  { %476 = vmatprep.mubr.msk.f32.mxu1 %vm546_vm2, %v547_v6 }
 0x130   :  { %477 = vmatmul.mubr.msk.f32.gmra.mrb[4].mxu1 %vm232_vm3, %v37_v60 }
 0x1fb   :  { %v308_v63 = vpop.f32.mrb[0].mxu1 }
 0x1fc   :  { %v309_v0 = vadd.f32 %v308_v63, %v220_v61  ;;  %v472_v1 = vpop.f32.mrb[1].mxu1 }
 0x1fe   :  { %v322_v4 = vmax.f32 %v309_v0, 0.0 }
 0x1ff   :  { %v313_v3 = vpop.f32.mrb[2].mxu1 }
 0x200   :  { %v314_v5 = vadd.f32 %v313_v3, %v225_v62  ;;  %v475_v7 = vpop.f32.mrb[3].mxu1  ;;  %v340_v6 = vmul.f32 %v328_v8, %v322_v4 }
 0x202   :  { %v323_v9 = vmax.f32 %v314_v5, 0.0 }
 0x203   :  { %v318_v11 = vpop.f32.mrb[4].mxu1 }
 0x204   :  { %v341_v12 = vmul.f32 %v333_v10, %v323_v9  ;;  %v319_v13 = vadd.f32 %v318_v11, %v230_v2  ;;  %v478_v14 = vpop.f32.mrb[5].mxu1 }
 0x206   :  { %v343_v15 = vadd.f32 %v341_v12, %v340_v6  ;;  %v324_v16 = vmax.f32 %v319_v13, 0.0 }
 0x208   :  { %v342_v18 = vmul.f32 %v338_v17, %v324_v16 }
 0x20a   :  { %v344_v20 = vadd.f32 %v343_v15, %v342_v18 }
 0x20c   :  { %v345_v21 = vrot.slane %v344_v20, 4 }
 0x20e   :  { %v346_v23 = vadd.f32 %v345_v21, %v344_v20 }
 0x210   :  { %v347_v24 = vrot.slane %v346_v23, 2 }
 0x212   :  { %v348_v26 = vadd.f32 %v347_v24, %v346_v23 }
 0x214   :  { %v349_v28 = vrot.slane %v348_v26, 1 }
 0x216   :  { %v350_v30 = vadd.f32 %v349_v28, %v348_v26 }
 0x218   :  { %v360_v31 = vadd.f32 %v359_v29, %v350_v30 }
 0x21a   :  { %361 = vst [vmem:[#allocation3] sm:$0x1] %v360_v31 }
 0x21b   :  { %532 = shalt.err (!%p529_p4)
}
 0x21c   :  { %s533_s5 = scalar_lea.hbm %s752_s7, 16 }
 0x21d   :  { %p534_p5 = scmp.ne.s32.totalorder %s752_s7, %s533_s5  ;;  %p537_p6 = scmp.lt.u32.totalorder %s533_s5, %s752_s7 }
 0x21f   :  { %p539_p7 = pnand %p537_p6, %p534_p5 }
 0x221   :  { %542 = shalt.err (!%p539_p7)
}
 0x222   :  { %371 = dma.vmem_to_hbm [thread:$0]  %s369_s9, 16, %s752_s7, [#allocation4]  }
 0x223   :  { %543 = dma.done.wait [#allocation4], 16  }
 0x224   :  { %544 = vsyncadd [#allocation4], 4294967280 }
 0x225   :  { %375 = vsyncpa [#allocation4], 1 }

</bundles_post_ra>
